<compile_context>
chip_gen: v7x
topology: tpu7x:2x2x1
jax: 0.10.0
libtpu: 0.0.40
codegen_flags: <defaults>
</compile_context>

<pallas_src>
import functools
import math

import jax
import jax.numpy as jnp
from jax.experimental import pallas as pl
from jax.experimental.pallas import tpu as pltpu


# -----------------------------------------------------------------------------
# Kernel
# -----------------------------------------------------------------------------
def _actor_critic_kernel(s_ref, w1_ref, w2_ref, w3_ref, b_ref, out_ref, *, H, A):
    """Fused actor+critic forward for one batch tile.

    s_ref  : [bt, S]        state tile
    w1_ref : [S, 2H]        [W1a | W1v]
    w2_ref : [2H, 2H]       blockdiag(W2a, W2v)
    w3_ref : [2H, OUT_W]    cols [0,A) = actor head, col A = value head, rest 0
    b_ref  : [3, Wmax]      rows: [b1a|b1v], [b2a|b2v], padded b3 slab
    out_ref: [bt, OUT_W]    log-probs in cols [0,A), value in col A, zeros elsewhere
    """
    x = s_ref[...]  # [bt, S] f32

    h = jnp.tanh(
        jnp.dot(x, w1_ref[...], preferred_element_type=jnp.float32)
        + b_ref[0:1, : 2 * H]
    )
    h = jnp.tanh(
        jnp.dot(h, w2_ref[...], preferred_element_type=jnp.float32)
        + b_ref[1:2, : 2 * H]
    )

    outw = out_ref.shape[-1]
    z = (
        jnp.dot(h, w3_ref[...], preferred_element_type=jnp.float32)
        + b_ref[2:3, :outw]
    )  # [bt, OUT_W]; padded cols are exactly 0 (zero weights + zero bias)

    col = jax.lax.broadcasted_iota(jnp.int32, z.shape, 1)
    is_logit = col < A

    # Masked, numerically stable log-softmax over the first A columns only.
    neg_inf = jnp.float32(-jnp.inf)
    m = jnp.max(jnp.where(is_logit, z, neg_inf), axis=-1, keepdims=True)
    e = jnp.where(is_logit, jnp.exp(z - m), 0.0)
    logp = (z - m) - jnp.log(jnp.sum(e, axis=-1, keepdims=True))

    # Single lane-dense full-width store: logp | value | zeros.
    out_ref[...] = jnp.where(is_logit, logp, jnp.where(col == A, z, 0.0))


# -----------------------------------------------------------------------------
# Parameter packing (one-time, outside the jitted hot path)
# -----------------------------------------------------------------------------
def _round_up(x, m):
    return ((x + m - 1) // m) * m


def _block_diag(a, b):
    ra, ca = a.shape
    rb, cb = b.shape
    out = jnp.zeros((ra + rb, ca + cb), dtype=jnp.float32)
    out = out.at[:ra, :ca].set(a)
    out = out.at[ra:, ca:].set(b)
    return out


def prepare_params(params):
    """Pack PyTorch-layout params into the fused kernel layout. Call once."""

    def wT(n):
        return jnp.asarray(params[n], dtype=jnp.float32).T  # [in, out]

    def bb(n):
        return jnp.asarray(params[n], dtype=jnp.float32).reshape(1, -1)

    w1a, w1v = wT("a1_w"), wT("v1_w")  # [S, H]
    w2a, w2v = wT("a2_w"), wT("v2_w")  # [H, H]
    w3a, w3v = wT("a3_w"), wT("v3_w")  # [H, A], [H, 1]
    H = w1a.shape[1]
    A = w3a.shape[1]
    out_w = max(128, _round_up(A + 1, 128))  # lane-dense output width

    w1 = jnp.concatenate([w1a, w1v], axis=1)  # [S, 2H]
    w2 = _block_diag(w2a, w2v)                # [2H, 2H]

    # Layer-3 weights pre-padded to the lane-dense slab layout.
    w3 = jnp.zeros((2 * H, out_w), dtype=jnp.float32)
    w3 = w3.at[:H, :A].set(w3a)
    w3 = w3.at[H:, A : A + 1].set(w3v)        # [2H, OUT_W]

    b1 = jnp.concatenate([bb("a1_b"), bb("v1_b")], axis=1)  # [1, 2H]
    b2 = jnp.concatenate([bb("a2_b"), bb("v2_b")], axis=1)  # [1, 2H]
    b3 = jnp.zeros((1, out_w), dtype=jnp.float32)
    b3 = b3.at[:, :A].set(bb("a3_b"))
    b3 = b3.at[:, A : A + 1].set(bb("v3_b"))                # [1, OUT_W]

    wmax = max(2 * H, out_w)

    def pad(x):
        return jnp.pad(x, ((0, 0), (0, wmax - x.shape[1])))

    b_all = jnp.concatenate([pad(b1), pad(b2), pad(b3)], axis=0)  # [3, wmax]
    return {"w1": w1, "w2": w2, "w3": w3, "b": b_all, "H": H, "A": A}


# -----------------------------------------------------------------------------
# Pallas wrapper
# -----------------------------------------------------------------------------
_MAX_BT = 4096  # per-tile VMEM at 4096 rows is ~a few MiB, well under scoped limits


@functools.partial(jax.jit, static_argnames=("H", "A"))
def _heads(state, w1, w2, w3, b_all, *, H, A):
    """Returns [B, OUT_W] slab: log-probs in cols [0,A), value in col A."""
    B, S = state.shape
    out_w = w3.shape[1]
    x = state.astype(jnp.float32)

    # Pad batch only to a multiple of 8, then pick a tile that (a) stays under
    # the cap and (b) yields >= 2 grid steps whenever possible (v7x 2-TC sharding).
    Bp = _round_up(B, 8)
    if Bp <= 8:
        nt = 1
    else:
        nt = max(2, -(-Bp // _MAX_BT))
    bt = _round_up(-(-Bp // nt), 8)
    Bp = nt * bt
    if Bp != B:
        x = jnp.pad(x, ((0, Bp - B), (0, 0)))

    kernel = functools.partial(_actor_critic_kernel, H=H, A=A)

    out = pl.pallas_call(
        kernel,
        out_shape=jax.ShapeDtypeStruct((Bp, out_w), jnp.float32),
        grid=(nt,),
        in_specs=[
            pl.BlockSpec((bt, S), lambda i: (i, 0)),           # state: tiled over batch
            pl.BlockSpec(w1.shape, lambda i: (0, 0)),           # weights: VMEM-resident
            pl.BlockSpec(w2.shape, lambda i: (0, 0)),
            pl.BlockSpec(w3.shape, lambda i: (0, 0)),
            pl.BlockSpec(b_all.shape, lambda i: (0, 0)),
        ],
        out_specs=pl.BlockSpec((bt, out_w), lambda i: (i, 0)),  # lane-dense (128-wide)
        compiler_params=pltpu.CompilerParams(
            dimension_semantics=("parallel",),
        ),
    )(x, w1, w2, w3, b_all)
    return out[:B]


def actor_critic_forward(state, packed):
    """Mirrors (action_layer(state), value_layer(state)) -> (probs [B,A], value [B,1])."""
    A = packed["A"]
    out = _heads(state, packed["w1"], packed["w2"], packed["w3"], packed["b"],
                 H=packed["H"], A=A)
    probs = jnp.exp(out[:, :A])
    value = out[:, A : A + 1]
    return probs, value


def evaluate(state, action, packed):
    """Mirrors ActorCritic.evaluate: (log_prob(action), squeeze(value), entropy)."""
    A = packed["A"]
    out = _heads(state, packed["w1"], packed["w2"], packed["w3"], packed["b"],
                 H=packed["H"], A=A)
    logp = out[:, :A]
    value = out[:, A]
    action_logprobs = jnp.take_along_axis(
        logp, action.astype(jnp.int32)[:, None], axis=-1
    )[:, 0]
    probs = jnp.exp(logp)
    entropy = -jnp.sum(probs * logp, axis=-1)
    return action_logprobs, value, entropy


# -----------------------------------------------------------------------------
# Init + pure-JAX reference (for correctness check)
# -----------------------------------------------------------------------------
def init_params(key, state_dim, action_dim, n_latent_var):
    """PyTorch Linear default init: U[-1/sqrt(fan_in), 1/sqrt(fan_in)] for W and b."""
    shapes = {
        "a1_w": (n_latent_var, state_dim), "a1_b": (n_latent_var,),
        "a2_w": (n_latent_var, n_latent_var), "a2_b": (n_latent_var,),
        "a3_w": (action_dim, n_latent_var), "a3_b": (action_dim,),
        "v1_w": (n_latent_var, state_dim), "v1_b": (n_latent_var,),
        "v2_w": (n_latent_var, n_latent_var), "v2_b": (n_latent_var,),
        "v3_w": (1, n_latent_var), "v3_b": (1,),
    }
    params = {}
    keys = jax.random.split(key, len(shapes))
    for (name, shape), k in zip(shapes.items(), keys):
        wname = name[:-2] + "_w"           # bias uses its weight's fan_in
        fan_in = shapes[wname][-1]
        bound = 1.0 / math.sqrt(fan_in)
        params[name] = jax.random.uniform(
            k, shape, minval=-bound, maxval=bound, dtype=jnp.float32
        )
    return params


def _reference_forward(state, params):
    def lin(x, w, b):
        return x @ jnp.asarray(params[w]).T + jnp.asarray(params[b])

    ha = jnp.tanh(lin(state, "a1_w", "a1_b"))
    ha = jnp.tanh(lin(ha, "a2_w", "a2_b"))
    probs = jax.nn.softmax(lin(ha, "a3_w", "a3_b"), axis=-1)
    hv = jnp.tanh(lin(state, "v1_w", "v1_b"))
    hv = jnp.tanh(lin(hv, "v2_w", "v2_b"))
    value = lin(hv, "v3_w", "v3_b")
    return probs, value


def _check(state, action, params, packed):
    probs, value = actor_critic_forward(state, packed)
    jax.block_until_ready((probs, value))
    ref_probs, ref_value = _reference_forward(state, params)
    assert jnp.allclose(probs, ref_probs, atol=1e-5), "actor head mismatch"
    assert jnp.allclose(value, ref_value, atol=1e-5), "critic head mismatch"

    logp, v, ent = evaluate(state, action, packed)
    jax.block_until_ready((logp, v, ent))
    ref_logp = jnp.log(ref_probs)
    assert jnp.allclose(
        logp, jnp.take_along_axis(ref_logp, action[:, None], axis=-1)[:, 0], atol=1e-5
    ), "log-prob mismatch"
    assert jnp.allclose(v, ref_value[:, 0], atol=1e-5), "value mismatch"
    assert jnp.allclose(
        ent, -jnp.sum(ref_probs * ref_logp, axis=-1), atol=1e-5
    ), "entropy mismatch"


if __name__ == "__main__":
    key = jax.random.PRNGKey(0)
    state_dim, action_dim, n_latent_var = 16, 6, 32

    k_params, k_state1, k_act1, k_state2, k_act2 = jax.random.split(key, 5)
    params = init_params(k_params, state_dim, action_dim, n_latent_var)
    packed = prepare_params(params)  # one-time packing, outside the jitted path

    # Small batch (single tile path).
    state1 = jax.random.normal(k_state1, (8, state_dim), dtype=jnp.float32)
    action1 = jax.random.randint(k_act1, (8,), 0, action_dim)
    _check(state1, action1, params, packed)

    # Non-multiple-of-tile batch (2-step grid + padded last tile path).
    state2 = jax.random.normal(k_state2, (40, state_dim), dtype=jnp.float32)
    action2 = jax.random.randint(k_act2, (40,), 0, action_dim)
    _check(state2, action2, params, packed)

    # TODO(synk): act()'s Categorical sampling stays in plain JAX (jax.random.categorical);
    # it is host/glue code and not part of the kernelized forward.
    print("KERNEL_OK")
</pallas_src>

<mosaic_0001>
module attributes {stable_mosaic.version = 11 : i64} {
  func.func @_actor_critic_kernel(%arg0: i32, %arg1: memref<8x16xf32, #tpu.memory_space<vmem>>, %arg2: memref<16x64xf32, #tpu.memory_space<vmem>>, %arg3: memref<64x64xf32, #tpu.memory_space<vmem>>, %arg4: memref<64x128xf32, #tpu.memory_space<vmem>>, %arg5: memref<3x128xf32, #tpu.memory_space<vmem>>, %arg6: memref<8x128xf32, #tpu.memory_space<vmem>>) attributes {dimension_semantics = [#tpu.dimension_semantics<parallel>], iteration_bounds = array<i64: 1>, scalar_prefetch = 0 : i64, scratch_operands = 0 : i64, tpu.core_type = #tpu.core_type<tc>, window_params = [{transform_indices = @transform_0, window_bounds = array<i64: 8, 16>}, {pipeline_mode = #tpu.pipeline_mode<synchronous>, transform_indices = @transform_1, window_bounds = array<i64: 16, 64>}, {pipeline_mode = #tpu.pipeline_mode<synchronous>, transform_indices = @transform_2, window_bounds = array<i64: 64, 64>}, {pipeline_mode = #tpu.pipeline_mode<synchronous>, transform_indices = @transform_3, window_bounds = array<i64: 64, 128>}, {pipeline_mode = #tpu.pipeline_mode<synchronous>, transform_indices = @transform_4, window_bounds = array<i64: 3, 128>}, {transform_indices = @transform_5, window_bounds = array<i64: 8, 128>}]} {
    %c0 = arith.constant 0 : index
    %c0_0 = arith.constant 0 : index
    %0 = vector.load %arg1[%c0, %c0_0] : memref<8x16xf32, #tpu.memory_space<vmem>>, vector<8x16xf32>
    %c0_1 = arith.constant 0 : index
    %c0_2 = arith.constant 0 : index
    %1 = vector.load %arg2[%c0_1, %c0_2] : memref<16x64xf32, #tpu.memory_space<vmem>>, vector<16x64xf32>
    %cst = arith.constant dense<0.000000e+00> : vector<8x64xf32>
    %2 = tpu.matmul %0, %1, %cst {dimension_numbers = #tpu.dot_dimension_numbers<[1], [0], [0], [1], [0, 0, 1, 1], [], []>} : vector<8x16xf32>, vector<16x64xf32>, vector<8x64xf32> -> vector<8x64xf32>
    %c0_3 = arith.constant 0 : index
    %c0_4 = arith.constant 0 : index
    %3 = vector.load %arg5[%c0_3, %c0_4] : memref<3x128xf32, #tpu.memory_space<vmem>>, vector<1x64xf32>
    %4 = vector.broadcast %3 : vector<1x64xf32> to vector<8x64xf32>
    %5 = arith.addf %2, %4 : vector<8x64xf32>
    %6 = math.tanh %5 : vector<8x64xf32>
    %c0_5 = arith.constant 0 : index
    %c0_6 = arith.constant 0 : index
    %7 = vector.load %arg3[%c0_5, %c0_6] : memref<64x64xf32, #tpu.memory_space<vmem>>, vector<64x64xf32>
    %cst_7 = arith.constant dense<0.000000e+00> : vector<8x64xf32>
    %8 = tpu.matmul %6, %7, %cst_7 {dimension_numbers = #tpu.dot_dimension_numbers<[1], [0], [0], [1], [0, 0, 1, 1], [], []>} : vector<8x64xf32>, vector<64x64xf32>, vector<8x64xf32> -> vector<8x64xf32>
    %c1 = arith.constant 1 : index
    %c0_8 = arith.constant 0 : index
    %9 = vector.load %arg5[%c1, %c0_8] : memref<3x128xf32, #tpu.memory_space<vmem>>, vector<1x64xf32>
    %10 = vector.broadcast %9 : vector<1x64xf32> to vector<8x64xf32>
    %11 = arith.addf %8, %10 : vector<8x64xf32>
    %12 = math.tanh %11 : vector<8x64xf32>
    %c0_9 = arith.constant 0 : index
    %c0_10 = arith.constant 0 : index
    %13 = vector.load %arg4[%c0_9, %c0_10] : memref<64x128xf32, #tpu.memory_space<vmem>>, vector<64x128xf32>
    %cst_11 = arith.constant dense<0.000000e+00> : vector<8x128xf32>
    %14 = tpu.matmul %12, %13, %cst_11 {dimension_numbers = #tpu.dot_dimension_numbers<[1], [0], [0], [1], [0, 0, 1, 1], [], []>} : vector<8x64xf32>, vector<64x128xf32>, vector<8x128xf32> -> vector<8x128xf32>
    %c2 = arith.constant 2 : index
    %c0_12 = arith.constant 0 : index
    %15 = vector.load %arg5[%c2, %c0_12] : memref<3x128xf32, #tpu.memory_space<vmem>>, vector<1x128xf32>
    %16 = vector.broadcast %15 : vector<1x128xf32> to vector<8x128xf32>
    %17 = arith.addf %14, %16 : vector<8x128xf32>
    %18 = tpu.iota {dimensions = array<i32: 1>} : vector<8x128xi32>
    %c6_i32 = arith.constant 6 : i32
    %19 = vector.broadcast %c6_i32 : i32 to vector<8x128xi32>
    %20 = arith.cmpi slt, %18, %19 : vector<8x128xi32>
    %cst_13 = arith.constant 0xFF800000 : f32
    %21 = vector.broadcast %cst_13 : f32 to vector<8x128xf32>
    %22 = arith.select %20, %17, %21 : vector<8x128xi1>, vector<8x128xf32>
    %cst_14 = arith.constant dense<0xFF800000> : vector<8xf32>
    %23 = vector.multi_reduction <maximumf>, %22, %cst_14 [1] : vector<8x128xf32> to vector<8xf32>
    %24 = vector.shape_cast %23 : vector<8xf32> to vector<8x1xf32>
    %25 = vector.broadcast %24 : vector<8x1xf32> to vector<8x128xf32>
    %26 = arith.subf %17, %25 : vector<8x128xf32>
    %27 = math.exp %26 : vector<8x128xf32>
    %cst_15 = arith.constant 0.000000e+00 : f32
    %28 = vector.broadcast %cst_15 : f32 to vector<8x128xf32>
    %29 = arith.select %20, %27, %28 : vector<8x128xi1>, vector<8x128xf32>
    %30 = vector.broadcast %24 : vector<8x1xf32> to vector<8x128xf32>
    %31 = arith.subf %17, %30 : vector<8x128xf32>
    %cst_16 = arith.constant dense<0.000000e+00> : vector<8xf32>
    %32 = vector.multi_reduction <add>, %29, %cst_16 [1] : vector<8x128xf32> to vector<8xf32>
    %33 = vector.shape_cast %32 : vector<8xf32> to vector<8x1xf32>
    %34 = math.log %33 : vector<8x1xf32>
    %35 = vector.broadcast %34 : vector<8x1xf32> to vector<8x128xf32>
    %36 = arith.subf %31, %35 : vector<8x128xf32>
    %c6_i32_17 = arith.constant 6 : i32
    %37 = vector.broadcast %c6_i32_17 : i32 to vector<8x128xi32>
    %38 = arith.cmpi eq, %18, %37 : vector<8x128xi32>
    %cst_18 = arith.constant 0.000000e+00 : f32
    %39 = vector.broadcast %cst_18 : f32 to vector<8x128xf32>
    %40 = arith.select %38, %17, %39 : vector<8x128xi1>, vector<8x128xf32>
    %41 = arith.select %20, %36, %40 : vector<8x128xi1>, vector<8x128xf32>
    %c0_19 = arith.constant 0 : index
    %c0_20 = arith.constant 0 : index
    %42 = vector.load %arg6[%c0_19, %c0_20] : memref<8x128xf32, #tpu.memory_space<vmem>>, vector<8x128xf32>
    tpu.vector_store %arg6[%c0_19, %c0_20], %41 {strides = array<i32>} : memref<8x128xf32, #tpu.memory_space<vmem>>, vector<8x128xf32>,
    return
  }
  func.func @transform_0(%arg0: i32) -> (i32, i32) {
    %c0_i32 = arith.constant 0 : i32
    %c0_i32_0 = arith.constant 0 : i32
    return %arg0, %c0_i32 : i32, i32
  }
  func.func @transform_1(%arg0: i32) -> (i32, i32) {
    %c0_i32 = arith.constant 0 : i32
    %c0_i32_0 = arith.constant 0 : i32
    %c0_i32_1 = arith.constant 0 : i32
    return %c0_i32, %c0_i32_0 : i32, i32
  }
  func.func @transform_2(%arg0: i32) -> (i32, i32) {
    %c0_i32 = arith.constant 0 : i32
    %c0_i32_0 = arith.constant 0 : i32
    %c0_i32_1 = arith.constant 0 : i32
    return %c0_i32, %c0_i32_0 : i32, i32
  }
  func.func @transform_3(%arg0: i32) -> (i32, i32) {
    %c0_i32 = arith.constant 0 : i32
    %c0_i32_0 = arith.constant 0 : i32
    %c0_i32_1 = arith.constant 0 : i32
    return %c0_i32, %c0_i32_0 : i32, i32
  }
  func.func @transform_4(%arg0: i32) -> (i32, i32) {
    %c0_i32 = arith.constant 0 : i32
    %c0_i32_0 = arith.constant 0 : i32
    %c0_i32_1 = arith.constant 0 : i32
    return %c0_i32, %c0_i32_0 : i32, i32
  }
  func.func @transform_5(%arg0: i32) -> (i32, i32) {
    %c0_i32 = arith.constant 0 : i32
    %c0_i32_0 = arith.constant 0 : i32
    return %arg0, %c0_i32 : i32, i32
  }
}

</mosaic_0001>

<bundles_post_ra>
// kernel: _heads.1
= control target key start
LH: loop header
LB: loop body
LE: loop exit
PB: predicated region body
PF: predicated region fallthrough
CT: control target
= control target key end

     0   :  { %10 = vsyncpa [#allocation3], 0  ;;  %s728_s0 = inlined_call_operand.hbm [shape: f32[8,16], index: 0, kind: input, shape index: {}]   ;;  %s729_s1 = inlined_call_operand.hbm [shape: f32[16,64], index: 1, kind: input, shape index: {}]   ;;  %s730_s2 = inlined_call_operand.hbm [shape: f32[64,64], index: 2, kind: input, shape index: {}]   ;;  %s731_s3 = inlined_call_operand.hbm [shape: f32[64,128], index: 3, kind: input, shape index: {}]   ;;  %s732_s4 = inlined_call_operand.vmem [shape: f32[3,128], index: 4, kind: input, shape index: {}]   ;;  %s733_s5 = inlined_call_operand.hbm [shape: f32[8,128], index: 5, kind: output, shape index: {}]  }
   0x1   :  { %11 = vsyncpa [#allocation6], 0 }
   0x2   :  { %12 = vsyncpa [#allocation9], 0 }
   0x3   :  { %13 = vsyncpa [#allocation4], 0  ;;  %s602_s18 = smov [#allocation5]   ;;  %s484_s22 = scalar_lea.hbm %s729_s1, 256 }
   0x4   :  { %s29_s19 = sshll.u32 %s602_s18, 4  ;;  %p485_p0 = scmp.ne.s32.totalorder %s729_s1, %s484_s22  ;;  %s30_s19 = int_to_ptr.vmem [resolvable:$true] %s29_s19 }
   0x5   :  { %p488_p1 = scmp.lt.u32.totalorder %s484_s22, %s729_s1 }
   0x7   :  { %p490_p2 = pnand %p488_p1, %p485_p0 }
   0x9   :  { %493 = shalt.err (!%p490_p2)
}
   0xa   :  { %s494_s27 = scalar_lea.vmem %s30_s19, 256  ;;  %p499_p4 = scmp.lt.s32.totalorder %s30_s19, %s30_s19 }
   0xb   :  { %p495_p3 = scmp.ne.s32.totalorder %s30_s19, %s494_s27  ;;  %p500_p5 = scmp.lt.s32.totalorder %s494_s27, %s494_s27 }
   0xd   :  { %p501_p6 = por %p500_p5, %p499_p4 }
   0xf   :  { %p502_p7 = pnand %p501_p6, %p495_p3 }
  0x11   :  { %505 = shalt.err (!%p502_p7)
}
  0x12   :  { %s603_s28 = smov 128   ;;  %s604_s29 = smov 8  }
  0x13   :  { %35 = dma.hbm_to_vmem [thread:$0]  %s729_s1, 256, %s30_s19, [#allocation6], %s603_s28, %s603_s28, %s604_s29  }
  0x14   :  { %s605_s7 = smov [#allocation2]   ;;  %s606_s9 = smov [#allocation7]  }
  0x15   :  { %s20_s8 = sshll.u32 %s605_s7, 4  ;;  %s41_s10 = sshll.u32 %s606_s9, 4  ;;  %s21_s8 = int_to_ptr.vmem [resolvable:$true] %s20_s8  ;;  %s42_s10 = int_to_ptr.vmem [resolvable:$true] %s41_s10 }
  0x16   :  { %s506_s13 = scalar_lea.hbm %s728_s0, 128 }
  0x17   :  { %p507_p8 = scmp.ne.s32.totalorder %s728_s0, %s506_s13  ;;  %p510_p9 = scmp.lt.u32.totalorder %s506_s13, %s728_s0 }
  0x19   :  { %p512_p10 = pnand %p510_p9, %p507_p8 }
  0x1b   :  { %515 = shalt.err (!%p512_p10)
}
  0x1c   :  { %s516_s1 = scalar_lea.vmem %s21_s8, 128  ;;  %p521_p12 = scmp.lt.s32.totalorder %s21_s8, %s21_s8 }
  0x1d   :  { %p517_p11 = scmp.ne.s32.totalorder %s21_s8, %s516_s1  ;;  %p522_p13 = scmp.lt.s32.totalorder %s516_s1, %s516_s1 }
  0x1f   :  { %p523_p0 = por %p522_p13, %p521_p12 }
  0x21   :  { %p524_p1 = pnand %p523_p0, %p517_p11 }
  0x23   :  { %527 = shalt.err (!%p524_p1)
}
  0x24   :  { %23 = dma.hbm_to_vmem [thread:$0]  %s728_s0, 128, %s21_s8, [#allocation3]  }
  0x25   :  { %s528_s22 = scalar_lea.hbm %s730_s2, 1024 }
  0x26   :  { %p529_p2 = scmp.ne.s32.totalorder %s730_s2, %s528_s22  ;;  %p532_p3 = scmp.lt.u32.totalorder %s528_s22, %s730_s2 }
  0x28   :  { %p534_p4 = pnand %p532_p3, %p529_p2 }
  0x2a   :  { %537 = shalt.err (!%p534_p4)
}
  0x2b   :  { %s538_s27 = scalar_lea.vmem %s42_s10, 1024  ;;  %p543_p6 = scmp.lt.s32.totalorder %s42_s10, %s42_s10 }
  0x2c   :  { %p539_p5 = scmp.ne.s32.totalorder %s42_s10, %s538_s27  ;;  %p544_p7 = scmp.lt.s32.totalorder %s538_s27, %s538_s27 }
  0x2e   :  { %p545_p8 = por %p544_p7, %p543_p6 }
  0x30   :  { %p546_p9 = pnand %p545_p8, %p539_p5 }
  0x32   :  { %549 = shalt.err (!%p546_p9)
}
  0x33   :  { %47 = dma.hbm_to_vmem [thread:$0]  %s730_s2, 1024, %s42_s10, [#allocation6], %s603_s28, %s603_s28, %s604_s29  }
  0x34   :  { %s607_s6 = smov [#allocation8]   ;;  %s550_s11 = scalar_lea.hbm %s731_s3, 1024 }
  0x35   :  { %s53_s7 = sshll.u32 %s607_s6, 4  ;;  %p551_p10 = scmp.ne.s32.totalorder %s731_s3, %s550_s11  ;;  %s54_s7 = int_to_ptr.vmem [resolvable:$true] %s53_s7 }
  0x36   :  { %p554_p11 = scmp.lt.u32.totalorder %s550_s11, %s731_s3 }
  0x38   :  { %p556_p12 = pnand %p554_p11, %p551_p10 }
  0x3a   :  { %559 = shalt.err (!%p556_p12)
}
  0x3b   :  { %s560_s16 = scalar_lea.vmem %s54_s7, 1024  ;;  %p565_p0 = scmp.lt.s32.totalorder %s54_s7, %s54_s7 }
  0x3c   :  { %p561_p13 = scmp.ne.s32.totalorder %s54_s7, %s560_s16  ;;  %p566_p1 = scmp.lt.s32.totalorder %s560_s16, %s560_s16 }
  0x3e   :  { %p567_p2 = por %p566_p1, %p565_p0 }
  0x40   :  { %p568_p3 = pnand %p567_p2, %p561_p13 }
  0x42   :  { %571 = shalt.err (!%p568_p3)
}
  0x43   :  { %59 = dma.hbm_to_vmem [thread:$0]  %s731_s3, 1024, %s54_s7, [#allocation9], %s603_s28, %s603_s28, %s604_s29  }
  0x44   :  { %594 = dma.done.wait [#allocation3], 128  }
  0x45   :  { %595 = vsyncadd [#allocation3], 4294967168 }
  0x46   :  { %596 = dma.done.wait [#allocation6], 1280  }
  0x47   :  { %597 = vsyncadd [#allocation6], 4294966016 }
  0x48   :  { %598 = dma.done.wait [#allocation9], 1024  }
  0x49   :  { %599 = vsyncadd [#allocation9], 4294966272  ;;  %v608_v0 = vmov 0.0|0.0   ;;  %vm609_vm0 = vmmov 0   ;;  %v610_v1 = vmov 0.0   ;;  %v75_v2 = vld [vmem:[#allocation5] sm:$0xff]  ;;  %v331_v40 = vlaneseq }
  0x4a   :  { %439 = vmatprep.subr.bf16.mxu0 %v608_v0  ;;  %398 = vmatprep.mubr.msk.f32.mxu0 %vm609_vm0, %v610_v1  ;;  %v76_v3 = vld [vmem:[#allocation5 + $0x8] sm:$0xff]  ;;  %v157_v5 = vld [vmem:[#allocation7] sm:$0xff]  ;;  %v158_v6 = vld [vmem:[#allocation7 + $0x8] sm:$0xff]  ;;  %vm82_vm1 = vcmask 130048   ;;  %vm170_vm2 = vcmask 523264  }
  0x4b   :  { %442 = vmatprep.subr.bf16.mxu1 %v608_v0  ;;  %417 = vmatprep.mubr.msk.f32.mxu1 %vm609_vm0, %v610_v1  ;;  %v440_v4 = vpack.c.bf16 %v76_v3, %v75_v2  ;;  %v443_v7 = vpack.c.bf16 %v158_v6, %v157_v5  ;;  %v74_v8 = vld [vmem:[#allocation2] sm:$0xff]  ;;  %v159_v9 = vld [vmem:[#allocation7 + $0x10] sm:$0xff]  ;;  %v160_v10 = vld [vmem:[#allocation7 + $0x18] sm:$0xff]  ;;  %v332_v41 = vand.u32 127, %v331_v40 }
  0x4c   :  { %v446_v11 = vpack.c.bf16 %v160_v10, %v159_v9  ;;  %v161_v12 = vld [vmem:[#allocation7 + $0x20] sm:$0xff]  ;;  %v162_v13 = vld [vmem:[#allocation7 + $0x28] sm:$0xff]  ;;  %v163_v15 = vld [vmem:[#allocation7 + $0x30] sm:$0xff] }
  0x4d   :  { %441 = vmatpush3.bf16.msra.mxu0 %v440_v4  ;;  %444 = vmatpush3.bf16.msra.mxu1 %v443_v7  ;;  %v449_v14 = vpack.c.bf16 %v162_v13, %v161_v12  ;;  %v164_v16 = vld [vmem:[#allocation7 + $0x38] sm:$0xff]  ;;  %v245_v18 = vld [vmem:[#allocation8] sm:$0xff]  ;;  %v246_v19 = vld [vmem:[#allocation8 + $0x8] sm:$0xff]  ;;  %vm333_vm3 = vcmp.lt.s32.totalorder %v332_v41, 6  ;;  %vm346_vm4 = vcmp.eq.s32.totalorder %v332_v41, 6 }
  0x4e   :  { %454 = vmatprep.subr.bf16.mxu0 %v608_v0  ;;  %445 = vmatprep.subr.bf16.mxu1 %v608_v0  ;;  %v452_v17 = vpack.c.bf16 %v164_v16, %v163_v15  ;;  %v455_v20 = vpack.c.bf16 %v246_v19, %v245_v18  ;;  %v367_v21 = vld [vmem:[%s732_s4] ss:$0 sm:$0xff]  ;;  %v247_v26 = vld [vmem:[#allocation8 + $0x10] sm:$0xff]  ;;  %v248_v27 = vld [vmem:[#allocation8 + $0x18] sm:$0xff] }
  0x4f   :  { %v458_v28 = vpack.c.bf16 %v248_v27, %v247_v26  ;;  %v249_v29 = vld [vmem:[#allocation8 + $0x20] sm:$0xff]  ;;  %v250_v30 = vld [vmem:[#allocation8 + $0x28] sm:$0xff]  ;;  %v251_v32 = vld [vmem:[#allocation8 + $0x30] sm:$0xff] }
  0x50   :  { %399 = vmatmul.mubr.msk.f32.vlgmr.msra.gmra.mrb[0].mxu0 %vm82_vm1, %v74_v8  ;;  %v461_v31 = vpack.c.bf16 %v250_v30, %v249_v29  ;;  %v252_v33 = vld [vmem:[#allocation8 + $0x38] sm:$0xff]  ;;  %v369_v35 = vld [vmem:[%s732_s4 + $0x1] ss:$0 sm:$0xff]  ;;  %v371_v42 = vld [vmem:[%s732_s4 + $0x2] ss:$0 sm:$0xff]  ;;  %s611_s4 = smov [#allocation10]  }
  0x51   :  { %436 = vmatprep.mubr.msk.f32.mxu0 %vm609_vm0, %v610_v1  ;;  %447 = vmatpush3.bf16.msra.mxu1 %v446_v11  ;;  %v464_v34 = vpack.c.bf16 %v252_v33, %v251_v32  ;;  %s356_s19 = sshll.u32 %s611_s4, 4  ;;  %s357_s19 = int_to_ptr.vmem [resolvable:$true] %s356_s19 }
  0x52   :  { %448 = vmatprep.subr.bf16.mxu1 %v608_v0  ;;  %456 = vmatpush3.bf16.msra.mxu0 %v455_v20  ;;  %s572_s20 = scalar_lea.vmem %s357_s19, 128  ;;  %p577_p5 = scmp.lt.s32.totalorder %s357_s19, %s357_s19 }
  0x53   :  { %457 = vmatprep.subr.bf16.mxu0 %v608_v0  ;;  %p573_p4 = scmp.ne.s32.totalorder %s357_s19, %s572_s20  ;;  %p578_p6 = scmp.lt.s32.totalorder %s572_s20, %s572_s20 }
  0x55   :  { %450 = vmatpush3.bf16.msra.mxu1 %v449_v14  ;;  %p579_p7 = por %p578_p6, %p577_p5 }
  0x56   :  { %451 = vmatprep.subr.bf16.mxu1 %v608_v0  ;;  %459 = vmatpush3.bf16.msra.mxu0 %v458_v28 }
  0x57   :  { %460 = vmatprep.subr.bf16.mxu0 %v608_v0  ;;  %p580_p8 = pnand %p579_p7, %p573_p4 }
  0x59   :  { %453 = vmatpush3.bf16.msra.mxu1 %v452_v17 }
  0x5a   :  { %462 = vmatpush3.bf16.msra.mxu0 %v461_v31 }
  0x5b   :  { %463 = vmatprep.subr.bf16.mxu0 %v608_v0 }
  0x5e   :  { %465 = vmatpush3.bf16.msra.mxu0 %v464_v34 }
 0x123   :  { %v152_v22 = vpop.f32.mrb[0].mxu0 }
 0x124   :  { %v153_v23 = vadd.f32 %v367_v21, %v152_v22  ;;  %v400_v24 = vpop.f32.mrb[1].mxu0 }
 0x126   :  { %476 = vtanh.f32 %v153_v23 }
 0x130   :  { %v477_v25 = vpop.eup %476 }
 0x131   :  { %418 = vmatmul.mubr.msk.f32.vlgmr.msra.gmra.mrb[0].mxu1 %vm170_vm2, %v477_v25 }
 0x204   :  { %v240_v36 = vpop.f32.mrb[0].mxu1 }
 0x205   :  { %v241_v37 = vadd.f32 %v369_v35, %v240_v36  ;;  %v419_v38 = vpop.f32.mrb[1].mxu1 }
 0x207   :  { %478 = vtanh.f32 %v241_v37 }
 0x211   :  { %v479_v39 = vpop.eup %478 }
 0x212   :  { %437 = vmatmul.mubr.msk.f32.vlgmr.msra.gmra.mrb[2].mxu0 %vm170_vm2, %v479_v39 }
 0x2e5   :  { %v327_v43 = vpop.f32.mrb[2].mxu0 }
 0x2e6   :  { %v328_v44 = vadd.f32 %v371_v42, %v327_v43  ;;  %v438_v45 = vpop.f32.mrb[3].mxu0 }
 0x2e8   :  { %v334_v46 = vsel %vm333_vm3, %v328_v44, -inf  ;;  %v347_v56 = vsel %vm346_vm4, %v328_v44, 0.0 }
 0x2e9   :  { %335 = vmax.xlane.f32.xlu0 %v334_v46 }
 0x376   :  { %v336_v47 = vpop.xlane.xlu0 %335 }
 0x377   :  { %v337_v48 = vsub.f32 %v328_v44, %v336_v47 }
 0x379   :  { %v338_v49 = vmul.f32 1.442695, %v337_v48 }
 0x37b   :  { %480 = vpow2.f32 %v338_v49 }
 0x385   :  { %v481_v50 = vpop.eup %480 }
 0x386   :  { %v340_v51 = vsel %vm333_vm3, %v481_v50, 0.0 }
 0x387   :  { %341 = vadd.xlane.f32.xlu0 %v340_v51 }
 0x414   :  { %v342_v52 = vpop.xlane.xlu0 %341 }
 0x415   :  { %482 = vlog2.f32 %v342_v52 }
 0x41f   :  { %v483_v53 = vpop.eup %482 }
 0x420   :  { %v344_v54 = vmul.f32 0.6931472, %v483_v53 }
 0x422   :  { %v345_v55 = vsub.f32 %v337_v48, %v344_v54 }
 0x424   :  { %v348_v57 = vsel %vm333_vm3, %v345_v55, %v347_v56 }
 0x425   :  { %349 = vst [vmem:[#allocation10] sm:$0xff] %v348_v57 }
 0x426   :  { %583 = shalt.err (!%p580_p8)
}
 0x427   :  { %s584_s23 = scalar_lea.hbm %s733_s5, 128 }
 0x428   :  { %p585_p9 = scmp.ne.s32.totalorder %s733_s5, %s584_s23  ;;  %p588_p10 = scmp.lt.u32.totalorder %s584_s23, %s733_s5 }
 0x42a   :  { %p590_p11 = pnand %p588_p10, %p585_p9 }
 0x42c   :  { %593 = shalt.err (!%p590_p11)
}
 0x42d   :  { %359 = dma.vmem_to_hbm [thread:$0]  %s357_s19, 128, %s733_s5, [#allocation4]  }
 0x42e   :  { %600 = dma.done.wait [#allocation4], 128  }
 0x42f   :  { %601 = vsyncadd [#allocation4], 4294967168 }
 0x430   :  { %363 = vsyncpa [#allocation3], 1 }
 0x431   :  { %364 = vsyncpa [#allocation6], 1 }
 0x432   :  { %365 = vsyncpa [#allocation9], 1 }
 0x433   :  { %366 = vsyncpa [#allocation4], 1 }

</bundles_post_ra>
